<compile_context>
chip_gen: v6e
topology: v6e:2x2x1
jax: 0.10.0
libtpu: 0.0.40
codegen_flags: <defaults>
</compile_context>

<pallas_src>
import functools

import jax
import jax.numpy as jnp
from jax.experimental import pallas as pl
from jax.experimental.pallas import tpu as pltpu


def feed_forward_kernel(x_ref, w1_ref, b1_ref, w2_ref, b2_ref, u1_ref, u2_ref,
                        o_ref, *, dropout_rate, negative_slope):
    # ---- Linear(D -> H) on the MXU ----
    x = x_ref[...]                                                    # (tm, D)
    h = jnp.dot(x, w1_ref[...], preferred_element_type=jnp.float32)  # (tm, H)
    h = h + b1_ref[...].astype(jnp.float32)

    # ---- LeakyReLU(0.2) ----
    h = jnp.where(h >= 0.0, h, h * jnp.float32(negative_slope))

    # ---- Dropout #1 (inverted, training mode) ----
    scale = jnp.float32(1.0 / (1.0 - dropout_rate)) if dropout_rate > 0.0 else None
    if dropout_rate > 0.0:
        keep1 = u1_ref[...] >= jnp.float32(dropout_rate)
        h = jnp.where(keep1, h * scale, 0.0)

    # ---- Linear(H -> D) on the MXU ----
    h = h.astype(w2_ref.dtype)
    z = jnp.dot(h, w2_ref[...], preferred_element_type=jnp.float32)  # (tm, D)
    z = z + b2_ref[...].astype(jnp.float32)

    # ---- Dropout #2 ----
    if dropout_rate > 0.0:
        keep2 = u2_ref[...] >= jnp.float32(dropout_rate)
        z = jnp.where(keep2, z * scale, 0.0)

    o_ref[...] = z.astype(o_ref.dtype)


def feed_forward(x, w1, b1, w2, b2, *, dropout_rate, key, tm=512,
                 negative_slope=0.2, vmem_limit_bytes=48 * 1024 * 1024):
    """x: (B, S, D). w1: (D, H), b1: (H,), w2: (H, D), b2: (D,).

    Weights are stored already transposed relative to PyTorch's nn.Linear
    (in_features, out_features), so the kernel computes x @ w + b directly.
    """
    B, S, D = x.shape
    H = w1.shape[1]
    N = B * S

    # Row tile: as large as possible (pipeline overhead amortization), clamped
    # to the problem size and forced to divide N.
    tm = min(tm, N)
    while N % tm != 0:
        tm //= 2
    tm = max(tm, 1)

    x2 = x.reshape(N, D)
    b1_2 = b1.reshape(1, H)
    b2_2 = b2.reshape(1, D)

    # Host-side (jax.random) uniforms for dropout; uncorrelated per element.
    if dropout_rate > 0.0:
        k1, k2 = jax.random.split(key)
        u1 = jax.random.uniform(k1, (N, H), dtype=jnp.float32)
        u2 = jax.random.uniform(k2, (N, D), dtype=jnp.float32)
    else:
        u1 = jnp.zeros((N, H), dtype=jnp.float32)
        u2 = jnp.zeros((N, D), dtype=jnp.float32)

    kernel = functools.partial(feed_forward_kernel,
                               dropout_rate=float(dropout_rate),
                               negative_slope=float(negative_slope))

    itemsize = jnp.dtype(x.dtype).itemsize
    bytes_accessed = (
        N * D * itemsize            # x in
        + D * H * jnp.dtype(w1.dtype).itemsize
        + H + D                     # biases (approx)
        + H * D * jnp.dtype(w2.dtype).itemsize
        + N * H * 4 + N * D * 4     # dropout uniforms
        + N * D * itemsize          # out
    )
    cost = pl.CostEstimate(flops=4 * N * D * H,
                           transcendentals=0,
                           bytes_accessed=int(bytes_accessed))

    out = pl.pallas_call(
        kernel,
        out_shape=jax.ShapeDtypeStruct((N, D), x.dtype),
        grid=(N // tm,),
        in_specs=[
            pl.BlockSpec((tm, D), lambda i: (i, 0)),   # x rows
            pl.BlockSpec((D, H), lambda i: (0, 0)),    # w1 (resident)
            pl.BlockSpec((1, H), lambda i: (0, 0)),    # b1
            pl.BlockSpec((H, D), lambda i: (0, 0)),    # w2 (resident)
            pl.BlockSpec((1, D), lambda i: (0, 0)),    # b2
            pl.BlockSpec((tm, H), lambda i: (i, 0)),   # dropout uniforms #1
            pl.BlockSpec((tm, D), lambda i: (i, 0)),   # dropout uniforms #2
        ],
        out_specs=pl.BlockSpec((tm, D), lambda i: (i, 0)),
        compiler_params=pltpu.CompilerParams(
            dimension_semantics=("parallel",),          # tiles independent
            vmem_limit_bytes=vmem_limit_bytes,
        ),
        cost_estimate=cost,
    )(x2, w1, b1_2, w2, b2_2, u1, u2)

    return out.reshape(B, S, D)


if __name__ == "__main__":
    key = jax.random.PRNGKey(0)
    k_x, k_w1, k_b1, k_w2, k_b2, k_drop = jax.random.split(key, 6)

    # Small shapes consistent with the module: batch=2, seq=8, dim=32, hidden=64.
    # TODO(synk): dim=32 under-fills the 128-wide lane axis (masked stores); for
    # realistic transformer dims (>=128) the output is lane-dense automatically.
    B, S, D, H = 2, 8, 32, 64
    dropout_rate = 0.1

    x = jax.random.normal(k_x, (B, S, D), dtype=jnp.float32)

    # Deterministic synthetic Linear weights (stored as (in, out)).
    w1 = jax.random.normal(k_w1, (D, H), dtype=jnp.float32) * (1.0 / jnp.sqrt(D))
    b1 = jax.random.normal(k_b1, (H,), dtype=jnp.float32) * 0.01
    w2 = jax.random.normal(k_w2, (H, D), dtype=jnp.float32) * (1.0 / jnp.sqrt(H))
    b2 = jax.random.normal(k_b2, (D,), dtype=jnp.float32) * 0.01

    out = feed_forward(x, w1, b1, w2, b2,
                       dropout_rate=dropout_rate, key=k_drop)
    jax.block_until_ready(out)
    assert out.shape == (B, S, D)
    assert bool(jnp.all(jnp.isfinite(out)))
    print("KERNEL_OK")
</pallas_src>

<mosaic_0001>
module attributes {stable_mosaic.version = 11 : i64} {
  func.func @feed_forward_kernel(%arg0: i32, %arg1: memref<16x32xf32, #tpu.memory_space<vmem>>, %arg2: memref<32x64xf32, #tpu.memory_space<vmem>>, %arg3: memref<1x64xf32, #tpu.memory_space<vmem>>, %arg4: memref<64x32xf32, #tpu.memory_space<vmem>>, %arg5: memref<1x32xf32, #tpu.memory_space<vmem>>, %arg6: memref<16x64xf32, #tpu.memory_space<vmem>>, %arg7: memref<16x32xf32, #tpu.memory_space<vmem>>, %arg8: memref<16x32xf32, #tpu.memory_space<vmem>>) attributes {dimension_semantics = [#tpu.dimension_semantics<parallel>], iteration_bounds = array<i64: 1>, scalar_prefetch = 0 : i64, scratch_operands = 0 : i64, tpu.core_type = #tpu.core_type<tc>, window_params = [{transform_indices = @transform_0, window_bounds = array<i64: 16, 32>}, {pipeline_mode = #tpu.pipeline_mode<synchronous>, transform_indices = @transform_1, window_bounds = array<i64: 32, 64>}, {pipeline_mode = #tpu.pipeline_mode<synchronous>, transform_indices = @transform_2, window_bounds = array<i64: 1, 64>}, {pipeline_mode = #tpu.pipeline_mode<synchronous>, transform_indices = @transform_3, window_bounds = array<i64: 64, 32>}, {pipeline_mode = #tpu.pipeline_mode<synchronous>, transform_indices = @transform_4, window_bounds = array<i64: 1, 32>}, {transform_indices = @transform_5, window_bounds = array<i64: 16, 64>}, {transform_indices = @transform_6, window_bounds = array<i64: 16, 32>}, {transform_indices = @transform_7, window_bounds = array<i64: 16, 32>}]} {
    %c0 = arith.constant 0 : index
    %c0_0 = arith.constant 0 : index
    %0 = vector.load %arg1[%c0, %c0_0] : memref<16x32xf32, #tpu.memory_space<vmem>>, vector<16x32xf32>
    %c0_1 = arith.constant 0 : index
    %c0_2 = arith.constant 0 : index
    %1 = vector.load %arg2[%c0_1, %c0_2] : memref<32x64xf32, #tpu.memory_space<vmem>>, vector<32x64xf32>
    %cst = arith.constant dense<0.000000e+00> : vector<16x64xf32>
    %2 = tpu.matmul %0, %1, %cst {dimension_numbers = #tpu.dot_dimension_numbers<[1], [0], [0], [1], [0, 0, 1, 1], [], []>} : vector<16x32xf32>, vector<32x64xf32>, vector<16x64xf32> -> vector<16x64xf32>
    %c0_3 = arith.constant 0 : index
    %c0_4 = arith.constant 0 : index
    %3 = vector.load %arg3[%c0_3, %c0_4] : memref<1x64xf32, #tpu.memory_space<vmem>>, vector<1x64xf32>
    %4 = vector.broadcast %3 : vector<1x64xf32> to vector<16x64xf32>
    %5 = arith.addf %2, %4 : vector<16x64xf32>
    %cst_5 = arith.constant 0.000000e+00 : f32
    %6 = vector.broadcast %cst_5 : f32 to vector<16x64xf32>
    %7 = arith.cmpf oge, %5, %6 : vector<16x64xf32>
    %cst_6 = arith.constant 2.000000e-01 : f32
    %8 = vector.broadcast %cst_6 : f32 to vector<16x64xf32>
    %9 = arith.mulf %5, %8 : vector<16x64xf32>
    %10 = arith.select %7, %5, %9 : vector<16x64xi1>, vector<16x64xf32>
    %c0_7 = arith.constant 0 : index
    %c0_8 = arith.constant 0 : index
    %11 = vector.load %arg6[%c0_7, %c0_8] : memref<16x64xf32, #tpu.memory_space<vmem>>, vector<16x64xf32>
    %cst_9 = arith.constant 1.000000e-01 : f32
    %12 = vector.broadcast %cst_9 : f32 to vector<16x64xf32>
    %13 = arith.cmpf oge, %11, %12 : vector<16x64xf32>
    %cst_10 = arith.constant 1.11111116 : f32
    %14 = vector.broadcast %cst_10 : f32 to vector<16x64xf32>
    %15 = arith.mulf %10, %14 : vector<16x64xf32>
    %cst_11 = arith.constant 0.000000e+00 : f32
    %16 = vector.broadcast %cst_11 : f32 to vector<16x64xf32>
    %17 = arith.select %13, %15, %16 : vector<16x64xi1>, vector<16x64xf32>
    %c0_12 = arith.constant 0 : index
    %c0_13 = arith.constant 0 : index
    %18 = vector.load %arg4[%c0_12, %c0_13] : memref<64x32xf32, #tpu.memory_space<vmem>>, vector<64x32xf32>
    %cst_14 = arith.constant dense<0.000000e+00> : vector<16x32xf32>
    %19 = tpu.matmul %17, %18, %cst_14 {dimension_numbers = #tpu.dot_dimension_numbers<[1], [0], [0], [1], [0, 0, 1, 1], [], []>} : vector<16x64xf32>, vector<64x32xf32>, vector<16x32xf32> -> vector<16x32xf32>
    %c0_15 = arith.constant 0 : index
    %c0_16 = arith.constant 0 : index
    %20 = vector.load %arg5[%c0_15, %c0_16] : memref<1x32xf32, #tpu.memory_space<vmem>>, vector<1x32xf32>
    %21 = vector.broadcast %20 : vector<1x32xf32> to vector<16x32xf32>
    %22 = arith.addf %19, %21 : vector<16x32xf32>
    %c0_17 = arith.constant 0 : index
    %c0_18 = arith.constant 0 : index
    %23 = vector.load %arg7[%c0_17, %c0_18] : memref<16x32xf32, #tpu.memory_space<vmem>>, vector<16x32xf32>
    %cst_19 = arith.constant 1.000000e-01 : f32
    %24 = vector.broadcast %cst_19 : f32 to vector<16x32xf32>
    %25 = arith.cmpf oge, %23, %24 : vector<16x32xf32>
    %cst_20 = arith.constant 1.11111116 : f32
    %26 = vector.broadcast %cst_20 : f32 to vector<16x32xf32>
    %27 = arith.mulf %22, %26 : vector<16x32xf32>
    %cst_21 = arith.constant 0.000000e+00 : f32
    %28 = vector.broadcast %cst_21 : f32 to vector<16x32xf32>
    %29 = arith.select %25, %27, %28 : vector<16x32xi1>, vector<16x32xf32>
    %c0_22 = arith.constant 0 : index
    %c0_23 = arith.constant 0 : index
    %30 = vector.load %arg8[%c0_22, %c0_23] : memref<16x32xf32, #tpu.memory_space<vmem>>, vector<16x32xf32>
    tpu.vector_store %arg8[%c0_22, %c0_23], %29 {strides = array<i32>} : memref<16x32xf32, #tpu.memory_space<vmem>>, vector<16x32xf32>,
    return
  }
  func.func @transform_0(%arg0: i32) -> (i32, i32) {
    %c0_i32 = arith.constant 0 : i32
    %c0_i32_0 = arith.constant 0 : i32
    return %arg0, %c0_i32 : i32, i32
  }
  func.func @transform_1(%arg0: i32) -> (i32, i32) {
    %c0_i32 = arith.constant 0 : i32
    %c0_i32_0 = arith.constant 0 : i32
    %c0_i32_1 = arith.constant 0 : i32
    return %c0_i32, %c0_i32_0 : i32, i32
  }
  func.func @transform_2(%arg0: i32) -> (i32, i32) {
    %c0_i32 = arith.constant 0 : i32
    %c0_i32_0 = arith.constant 0 : i32
    %c0_i32_1 = arith.constant 0 : i32
    return %c0_i32, %c0_i32_0 : i32, i32
  }
  func.func @transform_3(%arg0: i32) -> (i32, i32) {
    %c0_i32 = arith.constant 0 : i32
    %c0_i32_0 = arith.constant 0 : i32
    %c0_i32_1 = arith.constant 0 : i32
    return %c0_i32, %c0_i32_0 : i32, i32
  }
  func.func @transform_4(%arg0: i32) -> (i32, i32) {
    %c0_i32 = arith.constant 0 : i32
    %c0_i32_0 = arith.constant 0 : i32
    %c0_i32_1 = arith.constant 0 : i32
    return %c0_i32, %c0_i32_0 : i32, i32
  }
  func.func @transform_5(%arg0: i32) -> (i32, i32) {
    %c0_i32 = arith.constant 0 : i32
    %c0_i32_0 = arith.constant 0 : i32
    return %arg0, %c0_i32 : i32, i32
  }
  func.func @transform_6(%arg0: i32) -> (i32, i32) {
    %c0_i32 = arith.constant 0 : i32
    %c0_i32_0 = arith.constant 0 : i32
    return %arg0, %c0_i32 : i32, i32
  }
  func.func @transform_7(%arg0: i32) -> (i32, i32) {
    %c0_i32 = arith.constant 0 : i32
    %c0_i32_0 = arith.constant 0 : i32
    return %arg0, %c0_i32 : i32, i32
  }
}

</mosaic_0001>

<bundles_post_ra>
// kernel: tpu_custom_call.1
= control target key start
LH: loop header
LB: loop body
LE: loop exit
PB: predicated region body
PF: predicated region fallthrough
CT: control target
= control target key end

     0   :  { %vm40_vm0 = vcmask 261120   ;;  %s446_s0 = inlined_call_operand.vmem [shape: f32[16,32], index: 0, kind: input, shape index: {}]   ;;  %s447_s1 = inlined_call_operand.vmem [shape: f32[32,64], index: 1, kind: input, shape index: {}]   ;;  %s448_s2 = inlined_call_operand.vmem [shape: f32[1,64], index: 2, kind: input, shape index: {}]   ;;  %s449_s3 = inlined_call_operand.vmem [shape: f32[64,32], index: 3, kind: input, shape index: {}]   ;;  %s450_s4 = inlined_call_operand.vmem [shape: f32[1,32], index: 4, kind: input, shape index: {}]   ;;  %s451_s5 = inlined_call_operand.vmem [shape: f32[16,64], index: 5, kind: input, shape index: {}]   ;;  %s452_s6 = inlined_call_operand.vmem [shape: f32[16,32], index: 6, kind: input, shape index: {}]   ;;  %s453_s7 = inlined_call_operand.hbm [shape: f32[16,32], index: 7, kind: output, shape index: {}]  }
   0x1   :  { %v32_v0 = vld [vmem:[%s447_s1 + $0x18] sm:$0xff]  ;;  %v31_v1 = vld [vmem:[%s447_s1 + $0x10] sm:$0xff]  ;;  %v30_v2 = vld [vmem:[%s447_s1 + $0x8] sm:$0xff] }
   0x2   :  { %281 = vmatprep.subr.mxu0 %v32_v0  ;;  %v27_v3 = vld [vmem:[%s446_s0] sm:$0xff]  ;;  %v143_v4 = vld [vmem:[%s449_s3 + $0x38] sm:$0xff]  ;;  %v142_v5 = vld [vmem:[%s449_s3 + $0x30] sm:$0xff] }
   0x3   :  { %282 = vmatpush3.msra.mxu0 %v32_v0  ;;  %289 = vmatprep.mubr.msk.f32.mxu0 %vm40_vm0, %v27_v3 }
   0x4   :  { %12 = vsyncpa [#allocation3], 0  ;;  %283 = vmatprep.subr.mxu0 %v31_v1  ;;  %292 = vmatprep.subr.mxu1 %v143_v4  ;;  %v29_v6 = vld [vmem:[%s447_s1] sm:$0xff]  ;;  %v28_v7 = vld [vmem:[%s446_s0 + $0x8] sm:$0xff]  ;;  %vm151_vm4 = vcmask 523264   ;;  %s336_s13 = smov [#allocation2]  }
   0x5   :  { %284 = vmatpush3.msra.mxu0 %v31_v1  ;;  %293 = vmatpush3.msra.mxu1 %v143_v4  ;;  %v141_v8 = vld [vmem:[%s449_s3 + $0x28] sm:$0xff]  ;;  %v140_v9 = vld [vmem:[%s449_s3 + $0x20] sm:$0xff]  ;;  %v139_v10 = vld [vmem:[%s449_s3 + $0x18] sm:$0xff]  ;;  %s248_s14 = sshll.u32 %s336_s13, 4  ;;  %s249_s14 = int_to_ptr.vmem [resolvable:$true] %s248_s14 }
   0x6   :  { %285 = vmatprep.subr.mxu0 %v30_v2  ;;  %294 = vmatprep.subr.mxu1 %v142_v5  ;;  %v138_v11 = vld [vmem:[%s449_s3 + $0x10] sm:$0xff]  ;;  %v137_v12 = vld [vmem:[%s449_s3 + $0x8] sm:$0xff]  ;;  %v136_v13 = vld [vmem:[%s449_s3] sm:$0xff]  ;;  %p319_p1 = scmp.lt.s32.totalorder %s249_s14, %s249_s14 }
   0x7   :  { %286 = vmatpush3.msra.mxu0 %v30_v2  ;;  %295 = vmatpush3.msra.mxu1 %v142_v5  ;;  %v259_v14 = vld [vmem:[%s448_s2] ss:$0 sm:$0xff]  ;;  %v129_v23 = vld [vmem:[%s451_s5 + $0x8] sm:$0xff] }
   0x8   :  { %287 = vmatprep.subr.mxu0 %v29_v6  ;;  %296 = vmatprep.subr.mxu1 %v141_v8  ;;  %v128_v20 = vld [vmem:[%s451_s5] sm:$0xff]  ;;  %vm131_vm5 = vcmp.ge.f32.partialorder %v129_v23, 0.1  ;;  %v234_v30 = vld [vmem:[%s452_s6 + $0x8] sm:$0xff] }
   0x9   :  { %288 = vmatpush3.msra.mxu0 %v29_v6  ;;  %297 = vmatpush3.msra.mxu1 %v141_v8  ;;  %vm130_vm3 = vcmp.ge.f32.partialorder %v128_v20, 0.1  ;;  %v262_v29 = vld [vmem:[%s450_s4] ss:$0 sm:$0xff]  ;;  %vm236_vm6 = vcmp.ge.f32.partialorder %v234_v30, 0.1 }
   0xa   :  { %290 = vmatmul.mubr.msk.f32.vlgmr.msra.gmra.mxu0 %vm40_vm0, %v28_v7  ;;  %298 = vmatprep.subr.mxu1 %v140_v9  ;;  %v233_v33 = vld [vmem:[%s452_s6] sm:$0xff]  ;;  %s314_s4 = scalar_lea.vmem %s249_s14, 256 }
   0xb   :  { %299 = vmatpush3.msra.mxu1 %v140_v9  ;;  %vm235_vm7 = vcmp.ge.f32.partialorder %v233_v33, 0.1  ;;  %p315_p0 = scmp.ne.s32.totalorder %s249_s14, %s314_s4  ;;  %p320_p2 = scmp.lt.s32.totalorder %s314_s4, %s314_s4 }
   0xc   :  { %300 = vmatprep.subr.mxu1 %v139_v10 }
   0xd   :  { %301 = vmatpush3.msra.mxu1 %v139_v10  ;;  %p321_p3 = por %p320_p2, %p319_p1 }
   0xe   :  { %302 = vmatprep.subr.mxu1 %v138_v11 }
   0xf   :  { %303 = vmatpush3.msra.mxu1 %v138_v11  ;;  %p322_p4 = pnand %p321_p3, %p315_p0 }
  0x10   :  { %304 = vmatprep.subr.mxu1 %v137_v12 }
  0x11   :  { %305 = vmatpush3.msra.mxu1 %v137_v12 }
  0x12   :  { %306 = vmatprep.subr.mxu1 %v136_v13 }
  0x13   :  { %307 = vmatpush3.msra.mxu1 %v136_v13 }
  0xca   :  { %v291_v15 = vpop.f32.mrf.mxu0 }
  0xcb   :  { %v119_v16 = vadd.f32 %v291_v15, %v259_v14 }
  0xcc   :  { %v113_v17 = vpop.f32.mrf.mxu0 }
  0xcd   :  { %vm123_vm1 = vcmp.ge.f32.partialorder %v119_v16, 0.0  ;;  %v125_v18 = vmul.f32 0.2, %v119_v16  ;;  %v114_v19 = vadd.f32 %v259_v14, %v113_v17 }
  0xcf   :  { %v127_v21 = vsel %vm123_vm1, %v119_v16, %v125_v18  ;;  %v124_v22 = vmul.f32 0.2, %v114_v19  ;;  %vm122_vm2 = vcmp.ge.f32.partialorder %v114_v19, 0.0 }
  0xd0   :  { %v133_v24 = vmul.f32 1.1111112, %v127_v21 }
  0xd1   :  { %v126_v25 = vsel %vm122_vm2, %v114_v19, %v124_v22 }
  0xd2   :  { %v132_v26 = vmul.f32 1.1111112, %v126_v25  ;;  %v135_v28 = vsel %vm131_vm5, %v133_v24, 0.0 }
  0xd4   :  { %v134_v27 = vsel %vm130_vm3, %v132_v26, 0.0 }
  0xd5   :  { %308 = vmatprep.mubr.msk.f32.mxu1 %vm151_vm4, %v134_v27 }
  0xd6   :  { %309 = vmatmul.mubr.msk.f32.vlgmr.msra.gmra.mxu1 %vm151_vm4, %v135_v28 }
 0x196   :  { %v310_v31 = vpop.f32.mrf.mxu1 }
 0x197   :  { %v230_v32 = vadd.f32 %v310_v31, %v262_v29 }
 0x198   :  { %v224_v34 = vpop.f32.mrf.mxu1 }
 0x199   :  { %v238_v35 = vmul.f32 1.1111112, %v230_v32  ;;  %v225_v36 = vadd.f32 %v262_v29, %v224_v34 }
 0x19b   :  { %v240_v37 = vsel %vm236_vm6, %v238_v35, 0.0  ;;  %v237_v38 = vmul.f32 1.1111112, %v225_v36 }
 0x19c   :  { %242 = vst.msk [vmem:[#allocation2 + $0x8] sm:$0xff] %vm40_vm0, %v240_v37 }
 0x19d   :  { %v239_v39 = vsel %vm235_vm7, %v237_v38, 0.0 }
 0x19e   :  { %241 = vst.msk [vmem:[#allocation2] sm:$0xff] %vm40_vm0, %v239_v39 }
 0x19f   :  { %325 = shalt.err (!%p322_p4)
}
 0x1a0   :  { %s337_s6 = smov 128   ;;  %s338_s15 = smov 8  }
 0x1a1   :  { %254 = dma.vmem_to_hbm [thread:$0]  %s249_s14, 256, %s453_s7, [#allocation3], %s337_s6, %s337_s6, %s338_s15  }
 0x1a2   :  { %334 = dma.done.wait [#allocation3], 256  }
 0x1a3   :  { %335 = vsyncadd [#allocation3], 4294967040 }
 0x1a4   :  { %258 = vsyncpa [#allocation3], 1 }

</bundles_post_ra>
